<compile_context>
chip_gen: v5e
topology: v5e:2x2
jax: 0.10.0
libtpu: 0.0.40
codegen_flags: <defaults>
</compile_context>

<pallas_src>
import functools

import jax
import jax.numpy as jnp
from jax.experimental import pallas as pl
from jax.experimental.pallas import tpu as pltpu

_LANES = 128
_MAX_TILE_ROWS = 2048  # 2048*128*4B = 1 MiB per buffer (f32), 2 MiB double-buffered


# ---------------------------------------------------------------------------
# Pallas kernel: tiled sum(|x|) over a [rows, 128] slab
#   grid = (n_outer, n_inner): outer axis "parallel" (megacore shard on v7x),
#   inner axis "arbitrary" (reduction).  Output = per-outer-block (8, 128)
#   partial sums; the output block is resident across the inner axis, so it
#   doubles as the accumulator (no scratch needed).
# ---------------------------------------------------------------------------
def _abs_partial_sum_kernel(x_ref, o_ref):
    @pl.when(pl.program_id(1) == 0)
    def _():
        o_ref[...] = jnp.zeros_like(o_ref)

    tile = jnp.abs(x_ref[...].astype(jnp.float32))          # (tile_rows, 128)
    # Fold tile_rows -> 8 sublanes with VPU adds; keep 1024 lane-parallel
    # partial sums (also better summation accuracy than one running scalar).
    o_ref[...] += jnp.sum(tile.reshape(-1, 8, _LANES), axis=0)


@jax.jit
def _abs_mean_pallas(x):
    """mean(|x|) of an arbitrary-shaped, arbitrary-dtype array."""
    numel = x.size
    flat = jnp.ravel(x)                      # native dtype; contiguous reshape

    # Packed-sublane granularity: 8 rows (f32), 16 (bf16), 32 (int8/fp8).
    sub = 8 * max(1, 4 // jnp.dtype(x.dtype).itemsize)
    rows_total = numel // _LANES

    # Pick the largest tile that fits; adapt down (in multiples of `sub`) for
    # small inputs so the kernel still runs on them.
    if rows_total >= _MAX_TILE_ROWS:
        tile_rows = _MAX_TILE_ROWS
    else:
        tile_rows = (rows_total // sub) * sub

    if tile_rows == 0:
        # Too small for even one (sub, 128) tile: launch overhead would
        # dominate, just use plain jnp.
        return jnp.sum(jnp.abs(flat.astype(jnp.float32))) / jnp.float32(numel)

    n_tiles = rows_total // tile_rows
    aligned_rows = n_tiles * tile_rows
    aligned_elems = aligned_rows * _LANES

    # Split the reduction across 2 cores when there is enough work and the
    # tile count divides evenly (exploited on v7x megacore; a no-op loop on
    # single-TC v5e/v6e).
    n_outer = 2 if (n_tiles >= 4 and n_tiles % 2 == 0) else 1
    n_inner = n_tiles // n_outer

    # Aligned prefix for the kernel.  In the common case aligned_elems == numel
    # this slice+reshape is free (identity slice + contiguous bitcast reshape).
    head = jax.lax.slice(flat, (0,), (aligned_elems,)).reshape(aligned_rows, _LANES)

    partials = pl.pallas_call(
        _abs_partial_sum_kernel,
        out_shape=jax.ShapeDtypeStruct((n_outer, 8, _LANES), jnp.float32),
        grid_spec=pltpu.PrefetchScalarGridSpec(
            num_scalar_prefetch=0,
            grid=(n_outer, n_inner),
            in_specs=[
                pl.BlockSpec(
                    (tile_rows, _LANES),
                    lambda c, i: (c * n_inner + i, 0),
                )
            ],
            out_specs=pl.BlockSpec((None, 8, _LANES), lambda c, i: (c, 0, 0)),
        ),
        compiler_params=pltpu.CompilerParams(
            dimension_semantics=("parallel", "arbitrary"),
        ),
    )(head)

    total = jnp.sum(partials)  # single cross-lane reduce, amortized over grid

    # Ragged tail (< one tile): handled with plain jnp, no pad copy needed.
    if aligned_elems < numel:
        tail = jax.lax.slice(flat, (aligned_elems,), (numel,))
        total = total + jnp.sum(jnp.abs(tail.astype(jnp.float32)))

    return total / jnp.float32(numel)


# ---------------------------------------------------------------------------
# LossWrapper (JAX): mirrors the PyTorch module's forward semantics
# ---------------------------------------------------------------------------
class Args:
    # Deterministic synthetic "config" matching the module's get_args defaults.
    wpr_loss_type = "l1"
    wpr_loss_weight = 10.0
    wpr_loss_weight_decay = 0.9
    wpr_loss_decay_schedule = 50
    wpr_loss_apply_to = "pred_target_delta_uvs"
    eps = 1e-7


class LossWrapper:
    def __init__(self, args):
        self.apply_to = [s for s in args.wpr_loss_apply_to.split(",") if s]
        self.eps = args.eps
        self.reg_type = args.wpr_loss_type
        self.weight = args.wpr_loss_weight
        self.weight_decay = args.wpr_loss_weight_decay
        self.decay_schedule = args.wpr_loss_decay_schedule
        self.num_iters = 0

    def __call__(self, data_dict, losses_dict):
        if self.num_iters == self.decay_schedule:
            self.weight = max(self.weight * self.weight_decay, self.eps)
            self.num_iters = 1
        if self.weight == self.eps:
            return losses_dict

        # TODO(synk): when apply_to has several tensors, fuse them into a
        # single pallas_call (pl.ANY refs) to amortize launch overhead.
        loss = jnp.float32(0.0)
        for tensor_name in self.apply_to:
            if self.reg_type == "l1":
                loss = loss + _abs_mean_pallas(data_dict[tensor_name])
            else:
                raise NotImplementedError(self.reg_type)
        loss = loss / len(self.apply_to)

        losses_dict["G_WPR"] = loss * jnp.float32(self.weight)

        if self.weight_decay != 1.0:
            self.num_iters += 1
        return losses_dict


# ---------------------------------------------------------------------------
if __name__ == "__main__":
    key = jax.random.PRNGKey(0)
    # 'pred_target_delta_uvs' is a per-pixel UV displacement map; small NCHW shape.
    x = jax.random.normal(key, (2, 4, 16, 16), dtype=jnp.float32)

    data_dict = {"pred_target_delta_uvs": x}
    losses_dict = {}

    wrapper = LossWrapper(Args())
    losses_dict = wrapper(data_dict, losses_dict)

    result = jax.block_until_ready(losses_dict["G_WPR"])

    # Pure-JAX reference check of the forward semantics.
    ref = jnp.mean(jnp.abs(x)) * jnp.float32(Args.wpr_loss_weight)
    assert jnp.allclose(result, ref, rtol=1e-5, atol=1e-6), (result, ref)

    print("KERNEL_OK")
</pallas_src>

<mosaic_0001>
module attributes {stable_mosaic.version = 11 : i64} {
  func.func @_abs_partial_sum_kernel(%arg0: i32, %arg1: i32, %arg2: memref<16x128xf32, #tpu.memory_space<vmem>>, %arg3: memref<1x8x128xf32, #tpu.memory_space<vmem>>) attributes {dimension_semantics = [#tpu.dimension_semantics<parallel>, #tpu.dimension_semantics<arbitrary>], iteration_bounds = array<i64: 1, 1>, scalar_prefetch = 0 : i64, scratch_operands = 0 : i64, tpu.core_type = #tpu.core_type<tc>, window_params = [{transform_indices = @transform_0, window_bounds = array<i64: 16, 128>}, {transform_indices = @transform_1, window_bounds = array<i64: 1, 8, 128>}]} {
    %c0_i32 = arith.constant 0 : i32
    %0 = arith.cmpi eq, %arg1, %c0_i32 : i32
    %1 = arith.extui %0 : i1 to i32
    %c0_i32_0 = arith.constant 0 : i32
    %2 = arith.cmpi ne, %1, %c0_i32_0 : i32
    scf.if %2 {
      %cst_8 = arith.constant 0.000000e+00 : f32
      %13 = vector.broadcast %cst_8 : f32 to vector<8x128xf32>
      %c0_9 = arith.constant 0 : index
      %c0_10 = arith.constant 0 : index
      %c0_11 = arith.constant 0 : index
      %14 = vector.load %arg3[%c0_9, %c0_10, %c0_11] : memref<1x8x128xf32, #tpu.memory_space<vmem>>, vector<1x8x128xf32>
      %15 = vector.shape_cast %14 : vector<1x8x128xf32> to vector<8x128xf32>
      %16 = vector.shape_cast %13 : vector<8x128xf32> to vector<1x8x128xf32>
      tpu.vector_store %arg3[%c0_9, %c0_10, %c0_11], %16 {strides = array<i32>} : memref<1x8x128xf32, #tpu.memory_space<vmem>>, vector<1x8x128xf32>,
    } else {
    }
    %c0 = arith.constant 0 : index
    %c0_1 = arith.constant 0 : index
    %3 = vector.load %arg2[%c0, %c0_1] : memref<16x128xf32, #tpu.memory_space<vmem>>, vector<16x128xf32>
    %4 = math.absf %3 : vector<16x128xf32>
    %c0_2 = arith.constant 0 : index
    %c0_3 = arith.constant 0 : index
    %c0_4 = arith.constant 0 : index
    %5 = vector.load %arg3[%c0_2, %c0_3, %c0_4] : memref<1x8x128xf32, #tpu.memory_space<vmem>>, vector<1x8x128xf32>
    %6 = vector.shape_cast %5 : vector<1x8x128xf32> to vector<8x128xf32>
    %7 = vector.shape_cast %4 : vector<16x128xf32> to vector<2x8x128xf32>
    %cst = arith.constant dense<0.000000e+00> : vector<8x128xf32>
    %8 = vector.multi_reduction <add>, %7, %cst [0] : vector<2x8x128xf32> to vector<8x128xf32>
    %9 = arith.addf %6, %8 : vector<8x128xf32>
    %c0_5 = arith.constant 0 : index
    %c0_6 = arith.constant 0 : index
    %c0_7 = arith.constant 0 : index
    %10 = vector.load %arg3[%c0_5, %c0_6, %c0_7] : memref<1x8x128xf32, #tpu.memory_space<vmem>>, vector<1x8x128xf32>
    %11 = vector.shape_cast %10 : vector<1x8x128xf32> to vector<8x128xf32>
    %12 = vector.shape_cast %9 : vector<8x128xf32> to vector<1x8x128xf32>
    tpu.vector_store %arg3[%c0_5, %c0_6, %c0_7], %12 {strides = array<i32>} : memref<1x8x128xf32, #tpu.memory_space<vmem>>, vector<1x8x128xf32>,
    return
  }
  func.func @transform_0(%arg0: i32, %arg1: i32) -> (i32, i32) {
    %c1_i32 = arith.constant 1 : i32
    %0 = arith.muli %arg0, %c1_i32 : i32
    %1 = arith.addi %0, %arg1 : i32
    %c0_i32 = arith.constant 0 : i32
    %c0_i32_0 = arith.constant 0 : i32
    return %1, %c0_i32 : i32, i32
  }
  func.func @transform_1(%arg0: i32, %arg1: i32) -> (i32, i32, i32) {
    %c0_i32 = arith.constant 0 : i32
    %c0_i32_0 = arith.constant 0 : i32
    %c0_i32_1 = arith.constant 0 : i32
    return %arg0, %c0_i32, %c0_i32_0 : i32, i32, i32
  }
}

</mosaic_0001>

<bundles_post_ra>
// kernel: _abs_mean_pallas.1
= control target key start
LH: loop header
LB: loop body
LE: loop exit
PB: predicated region body
PF: predicated region fallthrough
CT: control target
= control target key end

     0   :  { %s73_s0 = inlined_call_operand.vmem [shape: f32[16,128], index: 0, kind: input, shape index: {}]   ;;  %s74_s1 = inlined_call_operand.vmem [shape: f32[1,8,128], index: 1, kind: output, shape index: {}]  }
   0x1   :  { %v35_v0 = vld [vmem:[%s73_s0] sm:$0xff]  ;;  %v36_v1 = vld [vmem:[%s73_s0 + $0x8] sm:$0xff] }
   0x2   :  { %v37_v2 = vand.u32 2147483647, %v35_v0  ;;  %v38_v3 = vand.u32 2147483647, %v36_v1 }
   0x4   :  { %v40_v4 = vadd.f32 %v38_v3, %v37_v2 }
   0x6   :  { %42 = vst [vmem:[%s74_s1] sm:$0xff] %v40_v4 }

</bundles_post_ra>
